<compile_context>
chip_gen: v6e
topology: v6e:2x2x1
jax: 0.10.0
libtpu: 0.0.40
codegen_flags: <defaults>
</compile_context>

<pallas_src>
import math

import jax
import jax.numpy as jnp
from jax import lax
from jax.experimental import pallas as pl
from jax.experimental.pallas import tpu as pltpu  # noqa: F401  (TPU backend; tuning hooks)

# ---------------- config (small, consistent with GatoConfig fields) ----------
BATCH = 2
SEQ = 8
LAYER_WIDTH = 32          # config.layer_width
NUM_HEADS = 4             # config.num_attention_heads
HEAD_DIM = LAYER_WIDTH // NUM_HEADS
FF_HIDDEN = 64            # config.feedforward_hidden_size
LN_EPS = 1e-6


def _layernorm(v, gamma, beta):
    mu = jnp.mean(v, axis=-1, keepdims=True)
    var = jnp.mean((v - mu) ** 2, axis=-1, keepdims=True)
    return (v - mu) * lax.rsqrt(var + LN_EPS) * gamma + beta


def _gelu_exact(v):
    # nn.GELU() default = exact erf formulation
    return 0.5 * v * (1.0 + lax.erf(v * (1.0 / math.sqrt(2.0))))


def transformer_block_kernel(
    x_ref,        # (B*S, D)        fused batch of activations
    small_ref,    # (8 + B*S, 128)  packed: ln/bias vectors, fused qkv bias, additive mask
    wattn_ref,    # (D, 4*D)=(32,128) lane-dense [Wq*scale | Wk | Wv | Wo]
    w1_ref,       # (D, F)
    w2_ref,       # (F, D)
    o_ref,        # (B*S, D)
):
    D = LAYER_WIDTH
    F = FF_HIDDEN

    x = x_ref[...]                       # (R, D)
    R = x.shape[0]
    small = small_ref[...]               # (8+R, 128)
    wattn = wattn_ref[...]               # (D, 4D)

    g1 = small[0:1, :D]
    be1 = small[1:2, :D]
    bo = small[2:3, :D]
    g2 = small[3:4, :D]
    be2 = small[4:5, :D]
    b2 = small[5:6, :D]
    b1 = small[6:7, :F]
    bqkv = small[7:8, :]                 # (1, 128); lanes [3D:4D) are zero (dead tail)
    mask = small[8:8 + R, :R]            # (R, R) additive block-diagonal mask

    # ---- LayerNorm 1 (row-wise: batch fusion is exact) ----
    xn1 = _layernorm(x, g1, be1)

    # ---- fused QKV projection: one (R,D)x(D,4D) MXU op; last 32 lanes unused ----
    qkv = jnp.dot(xn1, wattn, preferred_element_type=jnp.float32) + bqkv   # (R, 128)

    # ---- Multi-head self-attention on 8-lane slices of the fused qkv ----
    heads = []
    for h in range(NUM_HEADS):           # static unrolled loop, H = 4
        lo = h * HEAD_DIM
        qh = qkv[:, lo:lo + HEAD_DIM]                       # scale folded into Wq/bq
        kh = qkv[:, D + lo:D + lo + HEAD_DIM]
        vh = qkv[:, 2 * D + lo:2 * D + lo + HEAD_DIM]

        # scores: q @ k^T via dot_general (contract last dims; no explicit transpose)
        s = lax.dot_general(qh, kh, (((1,), (1,)), ((), ())),
                            preferred_element_type=jnp.float32)
        s = s + mask
        s = s - jnp.max(s, axis=-1, keepdims=True)
        p = jnp.exp(s)
        p = p * pl.reciprocal(jnp.sum(p, axis=-1, keepdims=True), approx=False)

        heads.append(jnp.dot(p, vh, preferred_element_type=jnp.float32))   # (R, hd)

    # ---- single out-projection: lane-concat heads, one (R,D)x(D,D) matmul ----
    attn_cat = jnp.concatenate(heads, axis=1)               # (R, D)
    wo = wattn[:, 3 * D:4 * D]                               # (D, D)
    attn = jnp.dot(attn_cat, wo, preferred_element_type=jnp.float32) + bo

    # dropout(p) in eval mode == identity
    res1 = attn + x

    # ---- LayerNorm 2 ----
    xn2 = _layernorm(res1, g2, be2)

    # ---- Feed-forward: Linear -> GELU -> Linear (dropouts are identity) ----
    h1 = _gelu_exact(jnp.dot(xn2, w1_ref[...], preferred_element_type=jnp.float32) + b1)
    ff = jnp.dot(h1, w2_ref[...], preferred_element_type=jnp.float32) + b2

    o_ref[...] = (ff + res1).astype(o_ref.dtype)


def transformer_block(x, kernel_params):
    """x: (B, S, D). kernel_params: output of prepare_params()."""
    B, S, D = x.shape
    x2 = x.reshape(B * S, D)
    out2 = pl.pallas_call(
        transformer_block_kernel,
        out_shape=jax.ShapeDtypeStruct((B * S, D), x.dtype),
        # single invocation: no grid; all operands resident in VMEM (< 100 KiB total)
    )(x2, *kernel_params)
    return out2.reshape(B, S, D)


# ---------------- parameters --------------------------------------------------
def init_params(key):
    """Standard ("PyTorch-layout") parameters: W stored as (in, out), biases 1-D."""
    D, F = LAYER_WIDTH, FF_HIDDEN
    ks = jax.random.split(key, 16)

    def lin(kw, kb, fan_in, fan_out):
        w = jax.random.normal(kw, (fan_in, fan_out), jnp.float32) / math.sqrt(fan_in)
        b = 0.1 * jax.random.normal(kb, (fan_out,), jnp.float32)
        return w, b

    wq, bq = lin(ks[0], ks[1], D, D)
    wk, bk = lin(ks[2], ks[3], D, D)
    wv, bv = lin(ks[4], ks[5], D, D)
    wo, bo = lin(ks[6], ks[7], D, D)
    w1, b1 = lin(ks[8], ks[9], D, F)
    w2, b2 = lin(ks[10], ks[11], F, D)
    g1 = 1.0 + 0.1 * jax.random.normal(ks[12], (D,), jnp.float32)
    be1 = 0.1 * jax.random.normal(ks[13], (D,), jnp.float32)
    g2 = 1.0 + 0.1 * jax.random.normal(ks[14], (D,), jnp.float32)
    be2 = 0.1 * jax.random.normal(ks[15], (D,), jnp.float32)
    return (g1, be1, wq, bq, wk, bk, wv, bv, wo, bo, g2, be2, w1, b1, w2, b2)


def prepare_params(params):
    """One-time host-side prep: fused lane-dense attention weight, scale fold,
    single packed small-vector/mask operand."""
    (g1, be1, wq, bq, wk, bk, wv, bv, wo, bo, g2, be2, w1, b1, w2, b2) = params
    D, F = LAYER_WIDTH, FF_HIDDEN
    R = BATCH * SEQ
    scale = 1.0 / math.sqrt(HEAD_DIM)

    # Fused attention weight, lane-dense (32, 128): [Wq*scale | Wk | Wv | Wo].
    wattn = jnp.concatenate([wq * scale, wk, wv, wo], axis=1)          # (D, 4D)

    # Single packed operand for all small vectors + the attention mask.
    small = jnp.zeros((8 + R, 128), jnp.float32)
    small = small.at[0, :D].set(g1)
    small = small.at[1, :D].set(be1)
    small = small.at[2, :D].set(bo)
    small = small.at[3, :D].set(g2)
    small = small.at[4, :D].set(be2)
    small = small.at[5, :D].set(b2)
    small = small.at[6, :F].set(b1)
    small = small.at[7, :D].set(bq * scale)
    small = small.at[7, D:2 * D].set(bk)
    small = small.at[7, 2 * D:3 * D].set(bv)
    # lanes [3D:4D) of row 7 stay zero (bias of the unused Wo tail of the qkv matmul)

    # Host-precomputed additive block-diagonal mask: batches never attend across.
    group = jnp.arange(R) // SEQ
    mask = jnp.where(group[:, None] == group[None, :], 0.0, -1e30).astype(jnp.float32)
    small = small.at[8:8 + R, :R].set(mask)

    return (small, wattn, w1, w2)


# ---------------- pure-JAX reference ------------------------------------------
def reference(x, params):
    (g1, be1, wq, bq, wk, bk, wv, bv, wo, bo, g2, be2, w1, b1, w2, b2) = params

    def ln(v, g, b):
        mu = jnp.mean(v, axis=-1, keepdims=True)
        var = jnp.mean((v - mu) ** 2, axis=-1, keepdims=True)
        return (v - mu) / jnp.sqrt(var + LN_EPS) * g + b

    xn1 = ln(x, g1, be1)
    q = xn1 @ wq + bq
    k = xn1 @ wk + bk
    v = xn1 @ wv + bv
    B, S, D = x.shape
    H, hd = NUM_HEADS, HEAD_DIM
    qh = q.reshape(B, S, H, hd).transpose(0, 2, 1, 3)
    kh = k.reshape(B, S, H, hd).transpose(0, 2, 1, 3)
    vh = v.reshape(B, S, H, hd).transpose(0, 2, 1, 3)
    s = jnp.einsum("bhqd,bhkd->bhqk", qh, kh) / math.sqrt(hd)
    p = jax.nn.softmax(s, axis=-1)
    o = jnp.einsum("bhqk,bhkd->bhqd", p, vh).transpose(0, 2, 1, 3).reshape(B, S, D)
    attn = o @ wo + bo
    r1 = attn + x
    xn2 = ln(r1, g2, be2)
    ff = jax.nn.gelu(xn2 @ w1 + b1, approximate=False) @ w2 + b2
    return ff + r1


if __name__ == "__main__":
    key = jax.random.PRNGKey(0)
    kx, kp = jax.random.split(key)
    x = jax.random.normal(kx, (BATCH, SEQ, LAYER_WIDTH), jnp.float32)
    params = init_params(kp)
    kernel_params = prepare_params(params)   # one-time host-side prep (fuse, fold, pack)

    out = transformer_block(x, kernel_params)
    out = jax.block_until_ready(out)

    ref = reference(x, params)
    assert out.shape == (BATCH, SEQ, LAYER_WIDTH)
    assert jnp.allclose(out, ref, atol=1e-4, rtol=1e-4), "mismatch vs reference"

    print("KERNEL_OK")
</pallas_src>

<mosaic_0001>
module attributes {stable_mosaic.version = 11 : i64} {
  func.func @transformer_block_kernel(%arg0: memref<16x32xf32, #tpu.memory_space<vmem>>, %arg1: memref<24x128xf32, #tpu.memory_space<vmem>>, %arg2: memref<32x128xf32, #tpu.memory_space<vmem>>, %arg3: memref<32x64xf32, #tpu.memory_space<vmem>>, %arg4: memref<64x32xf32, #tpu.memory_space<vmem>>, %arg5: memref<16x32xf32, #tpu.memory_space<vmem>>) attributes {dimension_semantics = [], scalar_prefetch = 0 : i64, scratch_operands = 0 : i64, tpu.core_type = #tpu.core_type<tc>} {
    %c0 = arith.constant 0 : index
    %c0_0 = arith.constant 0 : index
    %0 = vector.load %arg0[%c0, %c0_0] : memref<16x32xf32, #tpu.memory_space<vmem>>, vector<16x32xf32>
    %c0_1 = arith.constant 0 : index
    %c0_2 = arith.constant 0 : index
    %1 = vector.load %arg1[%c0_1, %c0_2] : memref<24x128xf32, #tpu.memory_space<vmem>>, vector<24x128xf32>
    %c0_3 = arith.constant 0 : index
    %c0_4 = arith.constant 0 : index
    %2 = vector.load %arg2[%c0_3, %c0_4] : memref<32x128xf32, #tpu.memory_space<vmem>>, vector<32x128xf32>
    %3 = vector.extract_strided_slice %1 {offsets = [0, 0], sizes = [1, 32], strides = [1, 1]} : vector<24x128xf32> to vector<1x32xf32>
    %4 = vector.extract_strided_slice %1 {offsets = [1, 0], sizes = [1, 32], strides = [1, 1]} : vector<24x128xf32> to vector<1x32xf32>
    %5 = vector.extract_strided_slice %1 {offsets = [2, 0], sizes = [1, 32], strides = [1, 1]} : vector<24x128xf32> to vector<1x32xf32>
    %6 = vector.extract_strided_slice %1 {offsets = [3, 0], sizes = [1, 32], strides = [1, 1]} : vector<24x128xf32> to vector<1x32xf32>
    %7 = vector.extract_strided_slice %1 {offsets = [4, 0], sizes = [1, 32], strides = [1, 1]} : vector<24x128xf32> to vector<1x32xf32>
    %8 = vector.extract_strided_slice %1 {offsets = [5, 0], sizes = [1, 32], strides = [1, 1]} : vector<24x128xf32> to vector<1x32xf32>
    %9 = vector.extract_strided_slice %1 {offsets = [6, 0], sizes = [1, 64], strides = [1, 1]} : vector<24x128xf32> to vector<1x64xf32>
    %10 = vector.extract_strided_slice %1 {offsets = [7, 0], sizes = [1, 128], strides = [1, 1]} : vector<24x128xf32> to vector<1x128xf32>
    %11 = vector.extract_strided_slice %1 {offsets = [8, 0], sizes = [16, 16], strides = [1, 1]} : vector<24x128xf32> to vector<16x16xf32>
    %cst = arith.constant dense<0.000000e+00> : vector<16xf32>
    %12 = vector.multi_reduction <add>, %0, %cst [1] : vector<16x32xf32> to vector<16xf32>
    %13 = vector.shape_cast %12 : vector<16xf32> to vector<16x1xf32>
    %cst_5 = arith.constant 3.200000e+01 : f32
    %14 = vector.broadcast %cst_5 : f32 to vector<16x1xf32>
    %15 = arith.divf %13, %14 : vector<16x1xf32>
    %16 = vector.broadcast %15 : vector<16x1xf32> to vector<16x32xf32>
    %17 = arith.subf %0, %16 : vector<16x32xf32>
    %18 = arith.mulf %17, %17 : vector<16x32xf32>
    %cst_6 = arith.constant dense<0.000000e+00> : vector<16xf32>
    %19 = vector.multi_reduction <add>, %18, %cst_6 [1] : vector<16x32xf32> to vector<16xf32>
    %20 = vector.shape_cast %19 : vector<16xf32> to vector<16x1xf32>
    %cst_7 = arith.constant 3.200000e+01 : f32
    %21 = vector.broadcast %cst_7 : f32 to vector<16x1xf32>
    %22 = arith.divf %20, %21 : vector<16x1xf32>
    %23 = vector.broadcast %15 : vector<16x1xf32> to vector<16x32xf32>
    %24 = arith.subf %0, %23 : vector<16x32xf32>
    %cst_8 = arith.constant 9.99999997E-7 : f32
    %25 = vector.broadcast %cst_8 : f32 to vector<16x1xf32>
    %26 = arith.addf %22, %25 : vector<16x1xf32>
    %27 = math.rsqrt %26 : vector<16x1xf32>
    %28 = vector.broadcast %27 : vector<16x1xf32> to vector<16x32xf32>
    %29 = arith.mulf %24, %28 : vector<16x32xf32>
    %30 = vector.broadcast %3 : vector<1x32xf32> to vector<16x32xf32>
    %31 = arith.mulf %29, %30 : vector<16x32xf32>
    %32 = vector.broadcast %4 : vector<1x32xf32> to vector<16x32xf32>
    %33 = arith.addf %31, %32 : vector<16x32xf32>
    %cst_9 = arith.constant dense<0.000000e+00> : vector<16x128xf32>
    %34 = tpu.matmul %33, %2, %cst_9 {dimension_numbers = #tpu.dot_dimension_numbers<[1], [0], [0], [1], [0, 0, 1, 1], [], []>} : vector<16x32xf32>, vector<32x128xf32>, vector<16x128xf32> -> vector<16x128xf32>
    %35 = vector.broadcast %10 : vector<1x128xf32> to vector<16x128xf32>
    %36 = arith.addf %34, %35 : vector<16x128xf32>
    %37 = vector.extract_strided_slice %36 {offsets = [0, 0], sizes = [16, 8], strides = [1, 1]} : vector<16x128xf32> to vector<16x8xf32>
    %38 = vector.extract_strided_slice %36 {offsets = [0, 32], sizes = [16, 8], strides = [1, 1]} : vector<16x128xf32> to vector<16x8xf32>
    %39 = vector.extract_strided_slice %36 {offsets = [0, 64], sizes = [16, 8], strides = [1, 1]} : vector<16x128xf32> to vector<16x8xf32>
    %cst_10 = arith.constant dense<0.000000e+00> : vector<16x16xf32>
    %40 = tpu.matmul %37, %38, %cst_10 {dimension_numbers = #tpu.dot_dimension_numbers<[1], [1], [0], [0], [0, 0, 1, 0], [], []>} : vector<16x8xf32>, vector<16x8xf32>, vector<16x16xf32> -> vector<16x16xf32>
    %41 = arith.addf %40, %11 : vector<16x16xf32>
    %cst_11 = arith.constant dense<0xFF800000> : vector<16xf32>
    %42 = vector.multi_reduction <maximumf>, %41, %cst_11 [1] : vector<16x16xf32> to vector<16xf32>
    %43 = vector.shape_cast %42 : vector<16xf32> to vector<16x1xf32>
    %44 = vector.broadcast %43 : vector<16x1xf32> to vector<16x16xf32>
    %45 = arith.subf %41, %44 : vector<16x16xf32>
    %46 = math.exp %45 : vector<16x16xf32>
    %cst_12 = arith.constant dense<0.000000e+00> : vector<16xf32>
    %47 = vector.multi_reduction <add>, %46, %cst_12 [1] : vector<16x16xf32> to vector<16xf32>
    %48 = vector.shape_cast %47 : vector<16xf32> to vector<16x1xf32>
    %49 = tpu.reciprocal %48 : vector<16x1xf32> -> vector<16x1xf32>
    %50 = vector.broadcast %49 : vector<16x1xf32> to vector<16x16xf32>
    %51 = arith.mulf %46, %50 : vector<16x16xf32>
    %cst_13 = arith.constant dense<0.000000e+00> : vector<16x8xf32>
    %52 = tpu.matmul %51, %39, %cst_13 {dimension_numbers = #tpu.dot_dimension_numbers<[1], [0], [0], [1], [0, 0, 1, 1], [], []>} : vector<16x16xf32>, vector<16x8xf32>, vector<16x8xf32> -> vector<16x8xf32>
    %53 = vector.extract_strided_slice %36 {offsets = [0, 8], sizes = [16, 8], strides = [1, 1]} : vector<16x128xf32> to vector<16x8xf32>
    %54 = vector.extract_strided_slice %36 {offsets = [0, 40], sizes = [16, 8], strides = [1, 1]} : vector<16x128xf32> to vector<16x8xf32>
    %55 = vector.extract_strided_slice %36 {offsets = [0, 72], sizes = [16, 8], strides = [1, 1]} : vector<16x128xf32> to vector<16x8xf32>
    %cst_14 = arith.constant dense<0.000000e+00> : vector<16x16xf32>
    %56 = tpu.matmul %53, %54, %cst_14 {dimension_numbers = #tpu.dot_dimension_numbers<[1], [1], [0], [0], [0, 0, 1, 0], [], []>} : vector<16x8xf32>, vector<16x8xf32>, vector<16x16xf32> -> vector<16x16xf32>
    %57 = arith.addf %56, %11 : vector<16x16xf32>
    %cst_15 = arith.constant dense<0xFF800000> : vector<16xf32>
    %58 = vector.multi_reduction <maximumf>, %57, %cst_15 [1] : vector<16x16xf32> to vector<16xf32>
    %59 = vector.shape_cast %58 : vector<16xf32> to vector<16x1xf32>
    %60 = vector.broadcast %59 : vector<16x1xf32> to vector<16x16xf32>
    %61 = arith.subf %57, %60 : vector<16x16xf32>
    %62 = math.exp %61 : vector<16x16xf32>
    %cst_16 = arith.constant dense<0.000000e+00> : vector<16xf32>
    %63 = vector.multi_reduction <add>, %62, %cst_16 [1] : vector<16x16xf32> to vector<16xf32>
    %64 = vector.shape_cast %63 : vector<16xf32> to vector<16x1xf32>
    %65 = tpu.reciprocal %64 : vector<16x1xf32> -> vector<16x1xf32>
    %66 = vector.broadcast %65 : vector<16x1xf32> to vector<16x16xf32>
    %67 = arith.mulf %62, %66 : vector<16x16xf32>
    %cst_17 = arith.constant dense<0.000000e+00> : vector<16x8xf32>
    %68 = tpu.matmul %67, %55, %cst_17 {dimension_numbers = #tpu.dot_dimension_numbers<[1], [0], [0], [1], [0, 0, 1, 1], [], []>} : vector<16x16xf32>, vector<16x8xf32>, vector<16x8xf32> -> vector<16x8xf32>
    %69 = vector.extract_strided_slice %36 {offsets = [0, 16], sizes = [16, 8], strides = [1, 1]} : vector<16x128xf32> to vector<16x8xf32>
    %70 = vector.extract_strided_slice %36 {offsets = [0, 48], sizes = [16, 8], strides = [1, 1]} : vector<16x128xf32> to vector<16x8xf32>
    %71 = vector.extract_strided_slice %36 {offsets = [0, 80], sizes = [16, 8], strides = [1, 1]} : vector<16x128xf32> to vector<16x8xf32>
    %cst_18 = arith.constant dense<0.000000e+00> : vector<16x16xf32>
    %72 = tpu.matmul %69, %70, %cst_18 {dimension_numbers = #tpu.dot_dimension_numbers<[1], [1], [0], [0], [0, 0, 1, 0], [], []>} : vector<16x8xf32>, vector<16x8xf32>, vector<16x16xf32> -> vector<16x16xf32>
    %73 = arith.addf %72, %11 : vector<16x16xf32>
    %cst_19 = arith.constant dense<0xFF800000> : vector<16xf32>
    %74 = vector.multi_reduction <maximumf>, %73, %cst_19 [1] : vector<16x16xf32> to vector<16xf32>
    %75 = vector.shape_cast %74 : vector<16xf32> to vector<16x1xf32>
    %76 = vector.broadcast %75 : vector<16x1xf32> to vector<16x16xf32>
    %77 = arith.subf %73, %76 : vector<16x16xf32>
    %78 = math.exp %77 : vector<16x16xf32>
    %cst_20 = arith.constant dense<0.000000e+00> : vector<16xf32>
    %79 = vector.multi_reduction <add>, %78, %cst_20 [1] : vector<16x16xf32> to vector<16xf32>
    %80 = vector.shape_cast %79 : vector<16xf32> to vector<16x1xf32>
    %81 = tpu.reciprocal %80 : vector<16x1xf32> -> vector<16x1xf32>
    %82 = vector.broadcast %81 : vector<16x1xf32> to vector<16x16xf32>
    %83 = arith.mulf %78, %82 : vector<16x16xf32>
    %cst_21 = arith.constant dense<0.000000e+00> : vector<16x8xf32>
    %84 = tpu.matmul %83, %71, %cst_21 {dimension_numbers = #tpu.dot_dimension_numbers<[1], [0], [0], [1], [0, 0, 1, 1], [], []>} : vector<16x16xf32>, vector<16x8xf32>, vector<16x8xf32> -> vector<16x8xf32>
    %85 = vector.extract_strided_slice %36 {offsets = [0, 24], sizes = [16, 8], strides = [1, 1]} : vector<16x128xf32> to vector<16x8xf32>
    %86 = vector.extract_strided_slice %36 {offsets = [0, 56], sizes = [16, 8], strides = [1, 1]} : vector<16x128xf32> to vector<16x8xf32>
    %87 = vector.extract_strided_slice %36 {offsets = [0, 88], sizes = [16, 8], strides = [1, 1]} : vector<16x128xf32> to vector<16x8xf32>
    %cst_22 = arith.constant dense<0.000000e+00> : vector<16x16xf32>
    %88 = tpu.matmul %85, %86, %cst_22 {dimension_numbers = #tpu.dot_dimension_numbers<[1], [1], [0], [0], [0, 0, 1, 0], [], []>} : vector<16x8xf32>, vector<16x8xf32>, vector<16x16xf32> -> vector<16x16xf32>
    %89 = arith.addf %88, %11 : vector<16x16xf32>
    %cst_23 = arith.constant dense<0xFF800000> : vector<16xf32>
    %90 = vector.multi_reduction <maximumf>, %89, %cst_23 [1] : vector<16x16xf32> to vector<16xf32>
    %91 = vector.shape_cast %90 : vector<16xf32> to vector<16x1xf32>
    %92 = vector.broadcast %91 : vector<16x1xf32> to vector<16x16xf32>
    %93 = arith.subf %89, %92 : vector<16x16xf32>
    %94 = math.exp %93 : vector<16x16xf32>
    %cst_24 = arith.constant dense<0.000000e+00> : vector<16xf32>
    %95 = vector.multi_reduction <add>, %94, %cst_24 [1] : vector<16x16xf32> to vector<16xf32>
    %96 = vector.shape_cast %95 : vector<16xf32> to vector<16x1xf32>
    %97 = tpu.reciprocal %96 : vector<16x1xf32> -> vector<16x1xf32>
    %98 = vector.broadcast %97 : vector<16x1xf32> to vector<16x16xf32>
    %99 = arith.mulf %94, %98 : vector<16x16xf32>
    %cst_25 = arith.constant dense<0.000000e+00> : vector<16x8xf32>
    %100 = tpu.matmul %99, %87, %cst_25 {dimension_numbers = #tpu.dot_dimension_numbers<[1], [0], [0], [1], [0, 0, 1, 1], [], []>} : vector<16x16xf32>, vector<16x8xf32>, vector<16x8xf32> -> vector<16x8xf32>
    %101 = tpu.concatenate %52, %68, %84, %100 in 1 : vector<16x8xf32>, vector<16x8xf32>, vector<16x8xf32>, vector<16x8xf32> -> vector<16x32xf32>
    %102 = vector.extract_strided_slice %2 {offsets = [0, 96], sizes = [32, 32], strides = [1, 1]} : vector<32x128xf32> to vector<32x32xf32>
    %cst_26 = arith.constant dense<0.000000e+00> : vector<16x32xf32>
    %103 = tpu.matmul %101, %102, %cst_26 {dimension_numbers = #tpu.dot_dimension_numbers<[1], [0], [0], [1], [0, 0, 1, 1], [], []>} : vector<16x32xf32>, vector<32x32xf32>, vector<16x32xf32> -> vector<16x32xf32>
    %104 = vector.broadcast %5 : vector<1x32xf32> to vector<16x32xf32>
    %105 = arith.addf %103, %104 : vector<16x32xf32>
    %106 = arith.addf %105, %0 : vector<16x32xf32>
    %cst_27 = arith.constant dense<0.000000e+00> : vector<16xf32>
    %107 = vector.multi_reduction <add>, %106, %cst_27 [1] : vector<16x32xf32> to vector<16xf32>
    %108 = vector.shape_cast %107 : vector<16xf32> to vector<16x1xf32>
    %cst_28 = arith.constant 3.200000e+01 : f32
    %109 = vector.broadcast %cst_28 : f32 to vector<16x1xf32>
    %110 = arith.divf %108, %109 : vector<16x1xf32>
    %111 = vector.broadcast %110 : vector<16x1xf32> to vector<16x32xf32>
    %112 = arith.subf %106, %111 : vector<16x32xf32>
    %113 = arith.mulf %112, %112 : vector<16x32xf32>
    %cst_29 = arith.constant dense<0.000000e+00> : vector<16xf32>
    %114 = vector.multi_reduction <add>, %113, %cst_29 [1] : vector<16x32xf32> to vector<16xf32>
    %115 = vector.shape_cast %114 : vector<16xf32> to vector<16x1xf32>
    %cst_30 = arith.constant 3.200000e+01 : f32
    %116 = vector.broadcast %cst_30 : f32 to vector<16x1xf32>
    %117 = arith.divf %115, %116 : vector<16x1xf32>
    %118 = vector.broadcast %110 : vector<16x1xf32> to vector<16x32xf32>
    %119 = arith.subf %106, %118 : vector<16x32xf32>
    %cst_31 = arith.constant 9.99999997E-7 : f32
    %120 = vector.broadcast %cst_31 : f32 to vector<16x1xf32>
    %121 = arith.addf %117, %120 : vector<16x1xf32>
    %122 = math.rsqrt %121 : vector<16x1xf32>
    %123 = vector.broadcast %122 : vector<16x1xf32> to vector<16x32xf32>
    %124 = arith.mulf %119, %123 : vector<16x32xf32>
    %125 = vector.broadcast %6 : vector<1x32xf32> to vector<16x32xf32>
    %126 = arith.mulf %124, %125 : vector<16x32xf32>
    %127 = vector.broadcast %7 : vector<1x32xf32> to vector<16x32xf32>
    %128 = arith.addf %126, %127 : vector<16x32xf32>
    %c0_32 = arith.constant 0 : index
    %c0_33 = arith.constant 0 : index
    %129 = vector.load %arg3[%c0_32, %c0_33] : memref<32x64xf32, #tpu.memory_space<vmem>>, vector<32x64xf32>
    %cst_34 = arith.constant dense<0.000000e+00> : vector<16x64xf32>
    %130 = tpu.matmul %128, %129, %cst_34 {dimension_numbers = #tpu.dot_dimension_numbers<[1], [0], [0], [1], [0, 0, 1, 1], [], []>} : vector<16x32xf32>, vector<32x64xf32>, vector<16x64xf32> -> vector<16x64xf32>
    %131 = vector.broadcast %9 : vector<1x64xf32> to vector<16x64xf32>
    %132 = arith.addf %130, %131 : vector<16x64xf32>
    %cst_35 = arith.constant 5.000000e-01 : f32
    %133 = vector.broadcast %cst_35 : f32 to vector<16x64xf32>
    %134 = arith.mulf %133, %132 : vector<16x64xf32>
    %cst_36 = arith.constant 0.707106769 : f32
    %135 = vector.broadcast %cst_36 : f32 to vector<16x64xf32>
    %136 = arith.mulf %132, %135 : vector<16x64xf32>
    %137 = math.erf %136 : vector<16x64xf32>
    %cst_37 = arith.constant 1.000000e+00 : f32
    %138 = vector.broadcast %cst_37 : f32 to vector<16x64xf32>
    %139 = arith.addf %138, %137 : vector<16x64xf32>
    %140 = arith.mulf %134, %139 : vector<16x64xf32>
    %c0_38 = arith.constant 0 : index
    %c0_39 = arith.constant 0 : index
    %141 = vector.load %arg4[%c0_38, %c0_39] : memref<64x32xf32, #tpu.memory_space<vmem>>, vector<64x32xf32>
    %cst_40 = arith.constant dense<0.000000e+00> : vector<16x32xf32>
    %142 = tpu.matmul %140, %141, %cst_40 {dimension_numbers = #tpu.dot_dimension_numbers<[1], [0], [0], [1], [0, 0, 1, 1], [], []>} : vector<16x64xf32>, vector<64x32xf32>, vector<16x32xf32> -> vector<16x32xf32>
    %143 = vector.broadcast %8 : vector<1x32xf32> to vector<16x32xf32>
    %144 = arith.addf %142, %143 : vector<16x32xf32>
    %145 = arith.addf %144, %106 : vector<16x32xf32>
    %c0_41 = arith.constant 0 : index
    %c0_42 = arith.constant 0 : index
    %146 = vector.load %arg5[%c0_41, %c0_42] : memref<16x32xf32, #tpu.memory_space<vmem>>, vector<16x32xf32>
    tpu.vector_store %arg5[%c0_41, %c0_42], %145 {strides = array<i32>} : memref<16x32xf32, #tpu.memory_space<vmem>>, vector<16x32xf32>,
    return
  }
}

</mosaic_0001>

<bundles_post_ra>
// kernel: tpu_custom_call.1
= control target key start
LH: loop header
LB: loop body
LE: loop exit
PB: predicated region body
PF: predicated region fallthrough
CT: control target
= control target key end

     0   :  { %10 = vsyncpa [#allocation3], 0  ;;  %s1960_s0 = inlined_call_operand.hbm [shape: f32[16,32], index: 0, kind: input, shape index: {}]   ;;  %s1961_s1 = inlined_call_operand.vmem [shape: f32[24,128], index: 1, kind: input, shape index: {}]   ;;  %s1962_s2 = inlined_call_operand.vmem [shape: f32[32,128], index: 2, kind: input, shape index: {}]   ;;  %s1963_s3 = inlined_call_operand.vmem [shape: f32[32,64], index: 3, kind: input, shape index: {}]   ;;  %s1964_s4 = inlined_call_operand.vmem [shape: f32[64,32], index: 4, kind: input, shape index: {}]   ;;  %s1965_s5 = inlined_call_operand.hbm [shape: f32[16,32], index: 5, kind: output, shape index: {}]  }
   0x1   :  { %11 = vsyncpa [#allocation4], 0  ;;  %s1661_s18 = smov [#allocation2]  }
   0x2   :  { %s17_s19 = sshll.u32 %s1661_s18, 4  ;;  %s18_s19 = int_to_ptr.vmem [resolvable:$true] %s17_s19 }
   0x3   :  { %s1625_s20 = scalar_lea.vmem %s18_s19, 256  ;;  %p1630_p1 = scmp.lt.s32.totalorder %s18_s19, %s18_s19 }
   0x4   :  { %p1626_p0 = scmp.ne.s32.totalorder %s18_s19, %s1625_s20  ;;  %p1631_p2 = scmp.lt.s32.totalorder %s1625_s20, %s1625_s20 }
   0x6   :  { %p1632_p3 = por %p1631_p2, %p1630_p1 }
   0x8   :  { %p1633_p4 = pnand %p1632_p3, %p1626_p0 }
   0xa   :  { %1636 = shalt.err (!%p1633_p4)
}
   0xb   :  { %s1662_s21 = smov 128   ;;  %s1663_s22 = smov 8  }
   0xc   :  { %23 = dma.hbm_to_vmem [thread:$0]  %s1960_s0, 256, %s18_s19, [#allocation3], %s1662_s21, %s1662_s21, %s1663_s22  }
   0xd   :  { %1657 = dma.done.wait [#allocation3], 256  }
   0xe   :  { %1658 = vsyncadd [#allocation3], 4294967040  ;;  %vm44_vm0 = vcmask 261120   ;;  %v1715_v0 = vld [vmem:[#allocation2] sm:$0xff]  ;;  %v1717_v1 = vld [vmem:[#allocation2 + $0x8] sm:$0xff]  ;;  %v72_v23 = vlaneseq  ;;  %vm175_vm1 = vcmask 64512  }
   0xf   :  { %v45_v2 = vsel %vm44_vm0, %v1715_v0, 0.0  ;;  %v48_v3 = vsel %vm44_vm0, %v1717_v1, 0.0  ;;  %v1730_v14 = vld [vmem:[%s1962_s2 + $0x18] sm:$0xff]  ;;  %v1735_v15 = vld [vmem:[%s1962_s2 + $0x10] sm:$0xff]  ;;  %v1742_v16 = vld [vmem:[%s1962_s2 + $0x8] sm:$0xff]  ;;  %s1664_s8 = smov 96  }
  0x10   :  { %46 = vadd.xlane.f32.xlu0 %v45_v2  ;;  %1447 = vmatprep.subr.mxu1 %v1730_v14  ;;  %v1751_v17 = vld [vmem:[%s1962_s2] sm:$0xff]  ;;  %v1755_v25 = vshrl.u32 %v72_v23, 7  ;;  %s1665_s9 = smov 120   ;;  %s1666_s10 = smov 88   ;;  %v1797_v51 = vld [vmem:[%s1961_s1 + $0x10] sm:$0xff]  ;;  %v1802_v53 = vld [vmem:[%s1961_s1 + $0x8] sm:$0xff] }
  0x11   :  { %1448 = vmatpush3.msra.mxu1 %v1730_v14  ;;  %v1761_v27 = vld [vmem:[%s1961_s1] sm:$0xff]  ;;  %vm259_vm2 = vcmask 130048   ;;  %s1667_s1 = smov 64   ;;  %s1668_s15 = smov 56   ;;  %vm997_vm3 = vcmask 195584   ;;  %vm1252_vm4 = vcmask 523264  }
  0x12   :  { %1449 = vmatprep.subr.mxu1 %v1735_v15  ;;  %v74_v26 = vsub.s32 0, %v1755_v25  ;;  %v80_v28 = vsub.s32 1, %v1755_v25  ;;  %v86_v39 = vsub.s32 7, %v1755_v25  ;;  %s1669_s16 = smov 80   ;;  %s1670_s17 = smov 112  }
  0x13   :  { %1450 = vmatpush3.msra.mxu1 %v1735_v15  ;;  %s1671_s18 = smov 48   ;;  %s1672_s19 = smov 72  }
  0x14   :  { %49 = vadd.xlane.f32.xlu0 %v48_v3  ;;  %1451 = vmatprep.subr.mxu1 %v1742_v16  ;;  %v75_v29 = vrot.slane %v1761_v27, %v74_v26  ;;  %v81_v32 = vrot.slane %v1761_v27, %v80_v28  ;;  %v87_v40 = vrot.slane %v1761_v27, %v86_v39  ;;  %s1673_s20 = smov 104   ;;  %s1674_s23 = smov 40  }
  0x15   :  { %1452 = vmatpush3.msra.mxu1 %v1742_v16  ;;  %s1675_s24 = smov 32   ;;  %s1676_s0 = smov 16  }
  0x16   :  { %1453 = vmatprep.subr.mxu1 %v1751_v17  ;;  %s1677_s25 = smov 24  }
  0x17   :  { %1454 = vmatpush3.msra.mxu1 %v1751_v17 }
  0x99   :  { %v47_v4 = vpop.xlane.xlu0 %46 }
  0x9a   :  { %v52_v5 = vmul.f32 0.03125, %v47_v4 }
  0x9c   :  { %v54_v6 = vsub.f32 %v1715_v0, %v52_v5 }
  0x9d   :  { %v50_v7 = vpop.xlane.xlu0 %49 }
  0x9e   :  { %v53_v8 = vmul.f32 0.03125, %v50_v7  ;;  %v56_v9 = vmul.f32 %v54_v6, %v54_v6 }
  0xa0   :  { %v55_v10 = vsub.f32 %v1717_v1, %v53_v8  ;;  %v58_v11 = vsel %vm44_vm0, %v56_v9, 0.0 }
  0xa1   :  { %59 = vadd.xlane.f32.xlu1 %v58_v11 }
  0xa2   :  { %v57_v12 = vmul.f32 %v55_v10, %v55_v10 }
  0xa4   :  { %v61_v13 = vsel %vm44_vm0, %v57_v12, 0.0 }
  0xa5   :  { %62 = vadd.xlane.f32.xlu1 %v61_v13 }
 0x12a   :  { %v60_v18 = vpop.xlane.xlu1 %59 }
 0x12b   :  { %v64_v19 = vmul.f32 0.03125, %v60_v18 }
 0x12d   :  { %v66_v20 = vadd.f32 1e-06, %v64_v19 }
 0x12e   :  { %v63_v21 = vpop.xlane.xlu1 %62 }
 0x12f   :  { %1573 = vrsqrt.f32 %v66_v20  ;;  %v65_v22 = vmul.f32 0.03125, %v63_v21 }
 0x131   :  { %v67_v24 = vadd.f32 1e-06, %v65_v22 }
 0x133   :  { %1575 = vrsqrt.f32 %v67_v24 }
 0x13c   :  { %v1574_v30 = vpop.eup %1573 }
 0x13d   :  { %v70_v31 = vmul.f32 %v1574_v30, %v54_v6 }
 0x13f   :  { %v76_v33 = vmul.f32 %v75_v29, %v70_v31 }
 0x140   :  { %v1576_v34 = vpop.eup %1575 }
 0x141   :  { %v71_v35 = vmul.f32 %v1576_v34, %v55_v10  ;;  %v82_v36 = vadd.f32 %v81_v32, %v76_v33 }
 0x143   :  { %v77_v37 = vmul.f32 %v75_v29, %v71_v35  ;;  %1455 = vmatprep.mubr.msk.f32.mxu1 %vm44_vm0, %v82_v36 }
 0x145   :  { %v83_v38 = vadd.f32 %v81_v32, %v77_v37 }
 0x147   :  { %1456 = vmatmul.mubr.msk.f32.vlgmr.msra.gmra.mxu1 %vm44_vm0, %v83_v38 }
 0x207   :  { %v1457_v41 = vpop.f32.mrf.mxu1 }
 0x208   :  { %v1770_v42 = vadd.f32 %v1457_v41, %v87_v40 }
 0x209   :  { %v160_v43 = vpop.f32.mrf.mxu1 }
 0x20a   :  { %v1772_v44 = vadd.f32 %v160_v43, %v87_v40  ;;  %173 = vrot.lane.b32.xlu0 %v1770_v42, %s1664_s8 }
 0x20c   :  { %171 = vrot.lane.b32.xlu1 %v1772_v44, %s1664_s8  ;;  %1462 = vmatprep.mubr.msk.f32.mxu1 %vm175_vm1, %v1772_v44 }
 0x20e   :  { %369 = vrot.lane.b32.xlu0 %v1772_v44, %s1665_s9 }
 0x210   :  { %375 = vrot.lane.b32.xlu1 %v1770_v42, %s1666_s10 }
 0x214   :  { %373 = vrot.lane.b32.xlu1 %v1772_v44, %s1666_s10 }
 0x218   :  { %371 = vrot.lane.b32.xlu1 %v1770_v42, %s1665_s9 }
 0x27c   :  { %v174_v45 = vpop.permute.xlu0 %173 }
 0x27d   :  { %1458 = vmatprep.subr.msk.mxu1 %vm175_vm1, %v174_v45 }
 0x27e   :  { %1459 = vmatpush3.xpose.msk.msra.mxu1 %vm175_vm1, %v174_v45  ;;  %v172_v46 = vpop.permute.xlu1 %171 }
 0x27f   :  { %1460 = vmatprep.subr.msk.mxu1 %vm175_vm1, %v172_v46 }
 0x280   :  { %v370_v48 = vpop.permute.xlu0 %369 }
 0x282   :  { %1461 = vmatpush3.xpose.msk.msra.mxu1 %vm175_vm1, %v172_v46  ;;  %v376_v47 = vpop.permute.xlu1 %375 }
 0x283   :  { %1472 = vmatprep.subr.msk.mxu1 %vm175_vm1, %v376_v47 }
 0x285   :  { %1463 = vmatmul.mubr.msk.f32.vlgmr.msra.gmra.mxu1 %vm175_vm1, %v1770_v42 }
 0x286   :  { %v374_v49 = vpop.permute.xlu1 %373  ;;  %1473 = vmatpush3.xpose.msk.msra.mxu1 %vm175_vm1, %v376_v47  ;;  %1476 = vmatprep.mubr.msk.f32.mxu1 %vm175_vm1, %v370_v48 }
 0x287   :  { %1474 = vmatprep.subr.msk.mxu1 %vm175_vm1, %v374_v49 }
 0x28a   :  { %1475 = vmatpush3.xpose.msk.msra.mxu1 %vm175_vm1, %v374_v49  ;;  %v372_v50 = vpop.permute.xlu1 %371 }
 0x28d   :  { %1477 = vmatmul.mubr.msk.f32.vlgmr.msra.gmra.mxu1 %vm175_vm1, %v372_v50 }
 0x345   :  { %v1464_v52 = vpop.f32.mrf.mxu1 }
 0x346   :  { %v256_v54 = vadd.f32 %v1464_v52, %v1797_v51 }
 0x347   :  { %v250_v55 = vpop.f32.mrf.mxu1 }
 0x348   :  { %v251_v56 = vadd.f32 %v250_v55, %v1802_v53  ;;  %v263_v57 = vsel %vm259_vm2, %v256_v54, -inf }
 0x349   :  { %264 = vmax.xlane.f32.xlu1 %v263_v57 }
 0x34a   :  { %v260_v58 = vsel %vm259_vm2, %v251_v56, -inf }
 0x34b   :  { %261 = vmax.xlane.f32.xlu0 %v260_v58 }
 0x34d   :  { %v1478_v59 = vpop.f32.mrf.mxu1 }
 0x34e   :  { %v457_v62 = vadd.f32 %v1478_v59, %v1797_v51 }
 0x34f   :  { %v451_v60 = vpop.f32.mrf.mxu1 }
 0x350   :  { %v452_v61 = vadd.f32 %v451_v60, %v1802_v53  ;;  %v463_v2 = vsel %vm259_vm2, %v457_v62, -inf }
 0x352   :  { %v460_v63 = vsel %vm259_vm2, %v452_v61, -inf }
 0x353   :  { %461 = vmax.xlane.f32.xlu0 %v460_v63 }
 0x357   :  { %464 = vmax.xlane.f32.xlu0 %v463_v2 }
 0x35a   :  { %282 = vrot.lane.b32.xlu1 %v1772_v44, %s1667_s1 }
 0x35e   :  { %484 = vrot.lane.b32.xlu1 %v1770_v42, %s1668_s15 }
 0x362   :  { %482 = vrot.lane.b32.xlu1 %v1772_v44, %s1668_s15 }
 0x36d   :  { %284 = vrot.lane.b32.xlu0 %v1770_v42, %s1667_s1 }
 0x3d2   :  { %v265_v3 = vpop.xlane.xlu1 %264 }
 0x3d3   :  { %v267_v4 = vsub.f32 %v256_v54, %v265_v3 }
 0x3d4   :  { %v262_v5 = vpop.xlane.xlu0 %261 }
 0x3d5   :  { %v270_v6 = vmul.f32 1.442695, %v267_v4  ;;  %v266_v7 = vsub.f32 %v251_v56, %v262_v5 }
 0x3d6   :  { %v283_v18 = vpop.permute.xlu1 %282 }
 0x3d7   :  { %1577 = vpow2.f32 %v270_v6  ;;  %v268_v8 = vmul.f32 1.442695, %v266_v7 }
 0x3d9   :  { %1579 = vpow2.f32 %v268_v8 }
 0x3da   :  { %v485_v26 = vpop.permute.xlu1 %484 }
 0x3dc   :  { %v462_v9 = vpop.xlane.xlu0 %461 }
 0x3dd   :  { %v466_v10 = vsub.f32 %v452_v61, %v462_v9 }
 0x3de   :  { %v483_v32 = vpop.permute.xlu1 %482 }
 0x3df   :  { %v468_v11 = vmul.f32 1.442695, %v466_v10 }
 0x3e0   :  { %v465_v12 = vpop.xlane.xlu0 %464 }
 0x3e1   :  { %1581 = vpow2.f32 %v468_v11  ;;  %v467_v13 = vsub.f32 %v457_v62, %v465_v12 }
 0x3e3   :  { %v470_v19 = vmul.f32 1.442695, %v467_v13 }
 0x3e4   :  { %v1578_v20 = vpop.eup %1577  ;;  %v285_v21 = vpop.permute.xlu0 %284 }
 0x3e5   :  { %1583 = vpow2.f32 %v470_v19  ;;  %1465 = vmatprep.subr.mxu0 %v285_v21  ;;  %v275_v22 = vsel %vm259_vm2, %v1578_v20, 0.0 }
 0x3e6   :  { %v1580_v23 = vpop.eup %1579  ;;  %276 = vadd.xlane.f32.xlu1 %v275_v22  ;;  %1466 = vmatpush3.msra.mxu0 %v285_v21 }
 0x3e7   :  { %1467 = vmatprep.subr.mxu0 %v283_v18  ;;  %v272_v24 = vsel %vm259_vm2, %v1580_v23, 0.0 }
 0x3e8   :  { %273 = vadd.xlane.f32.xlu0 %v272_v24  ;;  %1468 = vmatpush3.msra.mxu0 %v283_v18 }
 0x3e9   :  { %1479 = vmatprep.subr.mxu0 %v485_v26 }
 0x3ee   :  { %v1582_v28 = vpop.eup %1581 }
 0x3ef   :  { %v472_v29 = vsel %vm259_vm2, %v1582_v28, 0.0 }
 0x3f0   :  { %473 = vadd.xlane.f32.xlu0 %v472_v29 }
 0x3f2   :  { %v1584_v30 = vpop.eup %1583 }
 0x3f3   :  { %v475_v31 = vsel %vm259_vm2, %v1584_v30, 0.0 }
 0x3f4   :  { %476 = vadd.xlane.f32.xlu1 %v475_v31 }
 0x405   :  { %573 = vrot.lane.b32.xlu1 %v1772_v44, %s1669_s16 }
 0x406   :  { %575 = vrot.lane.b32.xlu0 %v1770_v42, %s1669_s16 }
 0x409   :  { %571 = vrot.lane.b32.xlu1 %v1770_v42, %s1670_s17 }
 0x40a   :  { %569 = vrot.lane.b32.xlu0 %v1772_v44, %s1670_s17 }
 0x46f   :  { %v277_v33 = vpop.xlane.xlu1 %276 }
 0x470   :  { %1585 = vrcp.f32 %v277_v33 }
 0x471   :  { %v274_v34 = vpop.xlane.xlu0 %273 }
 0x472   :  { %1587 = vrcp.f32 %v274_v34 }
 0x479   :  { %v474_v35 = vpop.xlane.xlu0 %473 }
 0x47a   :  { %1589 = vrcp.f32 %v474_v35 }
 0x47d   :  { %v477_v36 = vpop.xlane.xlu1 %476  ;;  %v1586_v37 = vpop.eup %1585 }
 0x47e   :  { %1591 = vrcp.f32 %v477_v36  ;;  %v281_v40 = vmul.f32 %v1586_v37, %v1578_v20  ;;  %v576_v41 = vpop.permute.xlu0 %575 }
 0x47f   :  { %v1588_v38 = vpop.eup %1587 }
 0x480   :  { %v280_v39 = vmul.f32 %v1588_v38, %v1580_v23 }
 0x481   :  { %v574_v49 = vpop.permute.xlu1 %573 }
 0x482   :  { %1469 = vmatprep.mubr.msk.f32.mxu0 %vm259_vm2, %v280_v39  ;;  %v570_v48 = vpop.permute.xlu0 %569 }
 0x483   :  { %1470 = vmatmul.mubr.msk.f32.vlgmr.msra.gmra.mxu0 %vm259_vm2, %v281_v40 }
 0x484   :  { %1480 = vmatpush3.msra.mxu0 %v485_v26 }
 0x485   :  { %1481 = vmatprep.subr.mxu0 %v483_v32  ;;  %v572_v50 = vpop.permute.xlu1 %571 }
 0x486   :  { %1482 = vmatpush3.msra.mxu0 %v483_v32 }
 0x487   :  { %v1590_v43 = vpop.eup %1589  ;;  %1486 = vmatprep.subr.msk.mxu0 %vm175_vm1, %v576_v41 }
 0x488   :  { %v480_v45 = vmul.f32 %v1590_v43, %v1582_v28 }
 0x48a   :  { %1483 = vmatprep.mubr.msk.f32.mxu0 %vm259_vm2, %v480_v45 }
 0x48b   :  { %v1592_v46 = vpop.eup %1591 }
 0x48c   :  { %v481_v47 = vmul.f32 %v1592_v46, %v1584_v30 }
 0x48e   :  { %1484 = vmatmul.mubr.msk.f32.vlgmr.msra.gmra.mxu0 %vm259_vm2, %v481_v47 }
 0x48f   :  { %1487 = vmatpush3.xpose.msk.msra.mxu0 %vm175_vm1, %v576_v41  ;;  %1490 = vmatprep.mubr.msk.f32.mxu0 %vm175_vm1, %v570_v48 }
 0x490   :  { %1488 = vmatprep.subr.msk.mxu0 %vm175_vm1, %v574_v49 }
 0x493   :  { %1489 = vmatpush3.xpose.msk.msra.mxu0 %vm175_vm1, %v574_v49 }
 0x496   :  { %1491 = vmatmul.mubr.msk.f32.vlgmr.msra.gmra.mxu0 %vm175_vm1, %v572_v50 }
 0x543   :  { %v1834_v52 = vpop.f32.mrf.mxu0 }
 0x545   :  { %v1836_v54 = vpop.f32.mrf.mxu0 }
 0x54e   :  { %v1838_v55 = vpop.f32.mrf.mxu0 }
 0x550   :  { %v1840_v56 = vpop.f32.mrf.mxu0 }
 0x556   :  { %v1492_v57 = vpop.f32.mrf.mxu0 }
 0x557   :  { %v657_v58 = vadd.f32 %v1492_v57, %v1797_v51 }
 0x558   :  { %v651_v59 = vpop.f32.mrf.mxu0 }
 0x559   :  { %v652_v60 = vadd.f32 %v651_v59, %v1802_v53  ;;  %v663_v61 = vsel %vm259_vm2, %v657_v58, -inf }
 0x55a   :  { %664 = vmax.xlane.f32.xlu1 %v663_v61 }
 0x55b   :  { %v660_v62 = vsel %vm259_vm2, %v652_v60, -inf }
 0x55c   :  { %661 = vmax.xlane.f32.xlu0 %v660_v62 }
 0x56b   :  { %682 = vrot.lane.b32.xlu1 %v1772_v44, %s1671_s18 }
 0x56f   :  { %775 = vrot.lane.b32.xlu1 %v1770_v42, %s1672_s19 }
 0x573   :  { %773 = vrot.lane.b32.xlu1 %v1772_v44, %s1672_s19 }
 0x577   :  { %771 = vrot.lane.b32.xlu1 %v1770_v42, %s1673_s20 }
 0x5e3   :  { %v665_v63 = vpop.xlane.xlu1 %664 }
 0x5e4   :  { %v667_v2 = vsub.f32 %v657_v58, %v665_v63 }
 0x5e5   :  { %v662_v3 = vpop.xlane.xlu0 %661 }
 0x5e6   :  { %v670_v4 = vmul.f32 1.442695, %v667_v2  ;;  %v666_v5 = vsub.f32 %v652_v60, %v662_v3 }
 0x5e7   :  { %v683_v13 = vpop.permute.xlu1 %682 }
 0x5e8   :  { %1593 = vpow2.f32 %v670_v4  ;;  %v668_v6 = vmul.f32 1.442695, %v666_v5 }
 0x5ea   :  { %1595 = vpow2.f32 %v668_v6 }
 0x5eb   :  { %v776_v19 = vpop.permute.xlu1 %775 }
 0x5ef   :  { %v774_v26 = vpop.permute.xlu1 %773 }
 0x5f3   :  { %v772_v28 = vpop.permute.xlu1 %771 }
 0x5f5   :  { %v1594_v7 = vpop.eup %1593 }
 0x5f6   :  { %v675_v8 = vsel %vm259_vm2, %v1594_v7, 0.0 }
 0x5f7   :  { %v1596_v9 = vpop.eup %1595  ;;  %676 = vadd.xlane.f32.xlu0 %v675_v8 }
 0x5f8   :  { %v672_v10 = vsel %vm259_vm2, %v1596_v9, 0.0 }
 0x5fb   :  { %673 = vadd.xlane.f32.xlu0 %v672_v10 }
 0x611   :  { %684 = vrot.lane.b32.xlu0 %v1770_v42, %s1671_s18 }
 0x615   :  { %769 = vrot.lane.b32.xlu0 %v1772_v44, %s1673_s20 }
 0x680   :  { %v677_v11 = vpop.xlane.xlu0 %676 }
 0x681   :  { %1597 = vrcp.f32 %v677_v11 }
 0x684   :  { %v674_v12 = vpop.xlane.xlu0 %673 }
 0x685   :  { %1599 = vrcp.f32 %v674_v12 }
 0x688   :  { %v685_v18 = vpop.permute.xlu0 %684 }
 0x689   :  { %1493 = vmatprep.subr.mxu1 %v685_v18 }
 0x68a   :  { %1494 = vmatpush3.msra.mxu1 %v685_v18 }
 0x68b   :  { %1495 = vmatprep.subr.mxu1 %v683_v13 }
 0x68c   :  { %1496 = vmatpush3.msra.mxu1 %v683_v13  ;;  %v770_v24 = vpop.permute.xlu0 %769 }
 0x68d   :  { %1500 = vmatprep.subr.msk.mxu1 %vm175_vm1, %v776_v19 }
 0x68e   :  { %v1598_v20 = vpop.eup %1597 }
 0x68f   :  { %v681_v23 = vmul.f32 %v1598_v20, %v1594_v7 }
 0x692   :  { %v1600_v21 = vpop.eup %1599 }
 0x693   :  { %v680_v22 = vmul.f32 %v1600_v21, %v1596_v9  ;;  %v1002_v9 = vsub.s32 2, %v1755_v25 }
 0x695   :  { %1497 = vmatprep.mubr.msk.f32.mxu1 %vm259_vm2, %v680_v22 }
 0x696   :  { %1498 = vmatmul.mubr.msk.f32.vlgmr.msra.gmra.mxu1 %vm259_vm2, %v681_v23 }
 0x697   :  { %1501 = vmatpush3.xpose.msk.msra.mxu1 %vm175_vm1, %v776_v19  ;;  %1504 = vmatprep.mubr.msk.f32.mxu1 %vm175_vm1, %v770_v24 }
 0x698   :  { %1502 = vmatprep.subr.msk.mxu1 %vm175_vm1, %v774_v26 }
 0x69b   :  { %1503 = vmatpush3.xpose.msk.msra.mxu1 %vm175_vm1, %v774_v26 }
 0x69e   :  { %1505 = vmatmul.mubr.msk.f32.vlgmr.msra.gmra.mxu1 %vm175_vm1, %v772_v28 }
 0x756   :  { %v1499_v29 = vpop.f32.mrf.mxu1 }
 0x758   :  { %v760_v30 = vpop.f32.mrf.mxu1 }
 0x75e   :  { %v1506_v31 = vpop.f32.mrf.mxu1 }
 0x75f   :  { %v857_v32 = vadd.f32 %v1506_v31, %v1797_v51  ;;  %v1144_v31 = vld [vmem:[%s1963_s3 + $0x18] sm:$0xff] }
 0x760   :  { %v851_v33 = vpop.f32.mrf.mxu1  ;;  %1525 = vmatprep.subr.mxu1 %v1144_v31 }
 0x761   :  { %v852_v34 = vadd.f32 %v851_v33, %v1802_v53  ;;  %v863_v35 = vsel %vm259_vm2, %v857_v32, -inf  ;;  %1526 = vmatpush3.msra.mxu1 %v1144_v31  ;;  %v1142_v33 = vld [vmem:[%s1963_s3 + $0x8] sm:$0xff] }
 0x762   :  { %864 = vmax.xlane.f32.xlu1 %v863_v35 }
 0x763   :  { %v860_v36 = vsel %vm259_vm2, %v852_v34, -inf }
 0x764   :  { %861 = vmax.xlane.f32.xlu0 %v860_v36 }
 0x773   :  { %882 = vrot.lane.b32.xlu1 %v1772_v44, %s1674_s23 }
 0x777   :  { %1014 = vrot.lane.b32.xlu1 %v1730_v14, %s1675_s24 }
 0x77b   :  { %1012 = vrot.lane.b32.xlu1 %v1735_v15, %s1675_s24 }
 0x77f   :  { %1010 = vrot.lane.b32.xlu1 %v1742_v16, %s1675_s24 }
 0x783   :  { %979 = vrot.lane.b32.xlu1 %v760_v30, %s1676_s0 }
 0x7eb   :  { %v865_v51 = vpop.xlane.xlu1 %864 }
 0x7ec   :  { %v867_v53 = vsub.f32 %v857_v32, %v865_v51  ;;  %v1143_v32 = vld [vmem:[%s1963_s3 + $0x10] sm:$0xff] }
 0x7ed   :  { %v862_v37 = vpop.xlane.xlu0 %861  ;;  %1527 = vmatprep.subr.mxu1 %v1143_v32 }
 0x7ee   :  { %v870_v38 = vmul.f32 1.442695, %v867_v53  ;;  %v866_v39 = vsub.f32 %v852_v34, %v862_v37  ;;  %1528 = vmatpush3.msra.mxu1 %v1143_v32  ;;  %v1141_v34 = vld [vmem:[%s1963_s3] sm:$0xff] }
 0x7ef   :  { %v883_v45 = vpop.permute.xlu1 %882  ;;  %1529 = vmatprep.subr.mxu1 %v1142_v33 }
 0x7f0   :  { %1601 = vpow2.f32 %v870_v38  ;;  %v868_v40 = vmul.f32 1.442695, %v866_v39  ;;  %1530 = vmatpush3.msra.mxu1 %v1142_v33  ;;  %v1131_v39 = vsub.s32 3, %v1755_v25 }
 0x7f1   :  { %1531 = vmatprep.subr.mxu1 %v1141_v34 }
 0x7f2   :  { %1603 = vpow2.f32 %v868_v40  ;;  %1532 = vmatpush3.msra.mxu1 %v1141_v34  ;;  %v1137_v40 = vsub.s32 4, %v1755_v25 }
 0x7f3   :  { %v1015_v47 = vpop.permute.xlu1 %1014 }
 0x7f7   :  { %v1013_v49 = vpop.permute.xlu1 %1012 }
 0x7fd   :  { %v1602_v41 = vpop.eup %1601 }
 0x7fe   :  { %v875_v44 = vsel %vm259_vm2, %v1602_v41, 0.0 }
 0x7ff   :  { %v1604_v43 = vpop.eup %1603  ;;  %876 = vadd.xlane.f32.xlu0 %v875_v44 }
 0x800   :  { %v872_v14 = vsel %vm259_vm2, %v1604_v43, 0.0 }
 0x803   :  { %873 = vadd.xlane.f32.xlu0 %v872_v14  ;;  %v1138_v14 = vrot.slane %v1761_v27, %v1137_v40 }
 0x819   :  { %884 = vrot.lane.b32.xlu0 %v1770_v42, %s1674_s23 }
 0x81d   :  { %971 = vrot.lane.b32.xlu0 %v1840_v56, %s1663_s22 }
 0x821   :  { %973 = vrot.lane.b32.xlu0 %v1838_v55, %s1663_s22 }
 0x825   :  { %981 = vrot.lane.b32.xlu0 %v1499_v29, %s1676_s0 }
 0x829   :  { %1008 = vrot.lane.b32.xlu0 %v1751_v17, %s1675_s24  ;;  %v1011_v17 = vpop.permute.xlu1 %1010 }
 0x82d   :  { %v980_v62 = vpop.permute.xlu1 %979 }
 0x888   :  { %v877_v15 = vpop.xlane.xlu0 %876 }
 0x889   :  { %1605 = vrcp.f32 %v877_v15 }
 0x88c   :  { %v874_v16 = vpop.xlane.xlu0 %873 }
 0x88d   :  { %1607 = vrcp.f32 %v874_v16 }
 0x890   :  { %v885_v46 = vpop.permute.xlu0 %884 }
 0x891   :  { %1507 = vmatprep.subr.mxu0 %v885_v46 }
 0x892   :  { %1508 = vmatpush3.msra.mxu0 %v885_v46 }
 0x893   :  { %1509 = vmatprep.subr.mxu0 %v883_v45 }
 0x894   :  { %1510 = vmatpush3.msra.mxu0 %v883_v45  ;;  %v972_v56 = vpop.permute.xlu0 %971 }
 0x895   :  { %1514 = vmatprep.subr.mxu0 %v1015_v47  ;;  %v993_v63 = vsel %vm175_vm1, %v1836_v54, %v972_v56  ;;  %v1003_v54 = vrot.slane %v1761_v27, %v1002_v9  ;;  %v1242_v56 = vld [vmem:[%s1964_s4 + $0x10] sm:$0xff] }
 0x896   :  { %v1606_v42 = vpop.eup %1605  ;;  %v995_v3 = vsel %vm259_vm2, %v993_v63, %v980_v62 }
 0x897   :  { %v881_v55 = vmul.f32 %v1606_v42, %v1602_v41  ;;  %v1132_v41 = vrot.slane %v1761_v27, %v1131_v39 }
 0x898   :  { %v974_v57 = vpop.permute.xlu0 %973 }
 0x899   :  { %v994_v5 = vsel %vm175_vm1, %v1834_v52, %v974_v57  ;;  %v1241_v57 = vld [vmem:[%s1964_s4 + $0x8] sm:$0xff] }
 0x89a   :  { %v1608_v48 = vpop.eup %1607 }
 0x89b   :  { %v880_v50 = vmul.f32 %v1608_v48, %v1604_v43  ;;  %v1247_v48 = vld [vmem:[%s1964_s4 + $0x38] sm:$0xff] }
 0x89c   :  { %v982_v58 = vpop.permute.xlu0 %981 }
 0x89d   :  { %1511 = vmatprep.mubr.msk.f32.mxu0 %vm259_vm2, %v880_v50  ;;  %v996_v6 = vsel %vm259_vm2, %v994_v5, %v982_v58  ;;  %v1245_v50 = vld [vmem:[%s1964_s4 + $0x28] sm:$0xff]  ;;  %v1240_v58 = vld [vmem:[%s1964_s4] sm:$0xff] }
 0x89e   :  { %1512 = vmatmul.mubr.msk.f32.vlgmr.msra.gmra.mxu0 %vm259_vm2, %v881_v55  ;;  %v1244_v55 = vld [vmem:[%s1964_s4 + $0x20] sm:$0xff] }
 0x89f   :  { %1515 = vmatpush3.msra.mxu0 %v1015_v47 }
 0x8a0   :  { %1516 = vmatprep.subr.mxu0 %v1013_v49  ;;  %v1009_v59 = vpop.permute.xlu0 %1008 }
 0x8a1   :  { %1517 = vmatpush3.msra.mxu0 %v1013_v49  ;;  %v1246_v49 = vld [vmem:[%s1964_s4 + $0x30] sm:$0xff] }
 0x8a2   :  { %1518 = vmatprep.subr.mxu0 %v1011_v17 }
 0x8a3   :  { %1519 = vmatpush3.msra.mxu0 %v1011_v17  ;;  %v1243_v17 = vld [vmem:[%s1964_s4 + $0x18] sm:$0xff]  ;;  %s1678_s4 = smov [#allocation5]  }
 0x8a4   :  { %1520 = vmatprep.subr.mxu0 %v1009_v59  ;;  %s1343_s24 = sshll.u32 %s1678_s4, 4  ;;  %s1344_s24 = int_to_ptr.vmem [resolvable:$true] %s1343_s24 }
 0x8a5   :  { %1521 = vmatpush3.msra.mxu0 %v1009_v59  ;;  %v1147_v59 = vsub.s32 6, %v1755_v25  ;;  %s1637_s0 = scalar_lea.vmem %s1344_s24, 256  ;;  %p1642_p6 = scmp.lt.s32.totalorder %s1344_s24, %s1344_s24 }
 0x8a6   :  { %1536 = vmatprep.subr.mxu0 %v1247_v48  ;;  %p1638_p5 = scmp.ne.s32.totalorder %s1344_s24, %s1637_s0  ;;  %p1643_p7 = scmp.lt.s32.totalorder %s1637_s0, %s1637_s0 }
 0x8a8   :  { %p1644_p8 = por %p1643_p7, %p1642_p6 }
 0x8aa   :  { %p1645_p9 = pnand %p1644_p8, %p1638_p5 }
 0x95e   :  { %v1513_v60 = vpop.f32.mrf.mxu0 }
 0x960   :  { %v960_v61 = vpop.f32.mrf.mxu0 }
 0x961   :  { %987 = vrot.lane.b32.xlu1 %v960_v61, %s1677_s25 }
 0x965   :  { %989 = vrot.lane.b32.xlu1 %v1513_v60, %s1677_s25  ;;  %v1148_v60 = vrot.slane %v1761_v27, %v1147_v59 }
 0x9d3   :  { %v988_v2 = vpop.permute.xlu1 %987 }
 0x9d4   :  { %v998_v4 = vsel %vm997_vm3, %v995_v3, %v988_v2 }
 0x9d5   :  { %1522 = vmatprep.mubr.msk.f32.mxu0 %vm44_vm0, %v998_v4 }
 0x9d7   :  { %v990_v7 = vpop.permute.xlu1 %989 }
 0x9d8   :  { %v999_v8 = vsel %vm997_vm3, %v996_v6, %v990_v7 }
 0x9d9   :  { %1523 = vmatmul.mubr.msk.f32.vlgmr.msra.gmra.mxu0 %vm44_vm0, %v999_v8 }
 0x9da   :  { %1537 = vmatpush3.msra.mxu0 %v1247_v48 }
 0x9db   :  { %1538 = vmatprep.subr.mxu0 %v1246_v49 }
 0x9dc   :  { %1539 = vmatpush3.msra.mxu0 %v1246_v49 }
 0x9dd   :  { %1540 = vmatprep.subr.mxu0 %v1245_v50 }
 0x9de   :  { %1541 = vmatpush3.msra.mxu0 %v1245_v50 }
 0x9df   :  { %1542 = vmatprep.subr.mxu0 %v1244_v55 }
 0x9e0   :  { %1543 = vmatpush3.msra.mxu0 %v1244_v55 }
 0x9e1   :  { %1544 = vmatprep.subr.mxu0 %v1243_v17 }
 0x9e2   :  { %1545 = vmatpush3.msra.mxu0 %v1243_v17 }
 0x9e3   :  { %1546 = vmatprep.subr.mxu0 %v1242_v56 }
 0x9e4   :  { %1547 = vmatpush3.msra.mxu0 %v1242_v56 }
 0x9e5   :  { %1548 = vmatprep.subr.mxu0 %v1241_v57 }
 0x9e6   :  { %1549 = vmatpush3.msra.mxu0 %v1241_v57 }
 0x9e7   :  { %1550 = vmatprep.subr.mxu0 %v1240_v58 }
 0x9e8   :  { %1551 = vmatpush3.msra.mxu0 %v1240_v58 }
 0xa99   :  { %v1524_v10 = vpop.f32.mrf.mxu0 }
 0xa9a   :  { %v1098_v11 = vadd.f32 %v1524_v10, %v1003_v54 }
 0xa9b   :  { %v1092_v12 = vpop.f32.mrf.mxu0 }
 0xa9c   :  { %v1891_v13 = vadd.f32 %v1098_v11, %v1717_v1  ;;  %v1093_v18 = vadd.f32 %v1092_v12, %v1003_v54  ;;  %v1250_v12 = vsub.s32 5, %v1755_v25 }
 0xa9e   :  { %v1894_v19 = vadd.f32 %v1093_v18, %v1715_v0  ;;  %v1106_v52 = vsel %vm44_vm0, %v1891_v13, 0.0  ;;  %v1251_v18 = vrot.slane %v1761_v27, %v1250_v12 }
 0xa9f   :  { %1107 = vadd.xlane.f32.xlu1 %v1106_v52 }
 0xaa0   :  { %v1103_v20 = vsel %vm44_vm0, %v1894_v19, 0.0 }
 0xaa1   :  { %1104 = vadd.xlane.f32.xlu0 %v1103_v20 }
 0xb28   :  { %v1108_v21 = vpop.xlane.xlu1 %1107 }
 0xb29   :  { %v1110_v22 = vmul.f32 0.03125, %v1108_v21 }
 0xb2a   :  { %v1105_v23 = vpop.xlane.xlu0 %1104 }
 0xb2b   :  { %v1109_v24 = vmul.f32 0.03125, %v1105_v23  ;;  %v1112_v26 = vsub.f32 %v1891_v13, %v1110_v22 }
 0xb2d   :  { %v1111_v1 = vsub.f32 %v1894_v19, %v1109_v24  ;;  %v1114_v29 = vmul.f32 %v1112_v26, %v1112_v26 }
 0xb2f   :  { %v1113_v28 = vmul.f32 %v1111_v1, %v1111_v1  ;;  %v1118_v30 = vsel %vm44_vm0, %v1114_v29, 0.0 }
 0xb31   :  { %v1115_v0 = vsel %vm44_vm0, %v1113_v28, 0.0 }
 0xb32   :  { %1116 = vadd.xlane.f32.xlu0 %v1115_v0 }
 0xb36   :  { %1119 = vadd.xlane.f32.xlu0 %v1118_v30 }
 0xbbb   :  { %v1117_v35 = vpop.xlane.xlu0 %1116 }
 0xbbc   :  { %v1121_v36 = vmul.f32 0.03125, %v1117_v35 }
 0xbbe   :  { %v1123_v51 = vadd.f32 1e-06, %v1121_v36 }
 0xbbf   :  { %v1120_v53 = vpop.xlane.xlu0 %1119 }
 0xbc0   :  { %1609 = vrsqrt.f32 %v1123_v51  ;;  %v1122_v37 = vmul.f32 0.03125, %v1120_v53 }
 0xbc2   :  { %v1124_v38 = vadd.f32 1e-06, %v1122_v37 }
 0xbc4   :  { %1611 = vrsqrt.f32 %v1124_v38 }
 0xbcd   :  { %v1610_v44 = vpop.eup %1609 }
 0xbce   :  { %v1127_v43 = vmul.f32 %v1610_v44, %v1111_v1 }
 0xbd0   :  { %v1133_v15 = vmul.f32 %v1132_v41, %v1127_v43 }
 0xbd1   :  { %v1612_v16 = vpop.eup %1611 }
 0xbd2   :  { %v1128_v45 = vmul.f32 %v1612_v16, %v1112_v26  ;;  %v1139_v46 = vadd.f32 %v1138_v14, %v1133_v15 }
 0xbd4   :  { %v1134_v47 = vmul.f32 %v1132_v41, %v1128_v45  ;;  %1533 = vmatprep.mubr.msk.f32.mxu1 %vm44_vm0, %v1139_v46 }
 0xbd6   :  { %v1140_v42 = vadd.f32 %v1138_v14, %v1134_v47 }
 0xbd8   :  { %1534 = vmatmul.mubr.msk.f32.vlgmr.msra.gmra.mxu1 %vm44_vm0, %v1140_v42 }
 0xc98   :  { %v1535_v61 = vpop.f32.mrf.mxu1 }
 0xc99   :  { %v1227_v62 = vadd.f32 %v1535_v61, %v1148_v60 }
 0xc9a   :  { %v1221_v63 = vpop.f32.mrf.mxu1 }
 0xc9b   :  { %v1233_v2 = vmul.f32 0.70710677, %v1227_v62  ;;  %v1222_v3 = vadd.f32 %v1221_v63, %v1148_v60  ;;  %v1231_v54 = vmul.f32 0.5, %v1227_v62 }
 0xc9d   :  { %1613 = verf.f32 %v1233_v2  ;;  %v1232_v4 = vmul.f32 0.70710677, %v1222_v3  ;;  %v1230_v8 = vmul.f32 0.5, %v1222_v3 }
 0xc9f   :  { %1615 = verf.f32 %v1232_v4 }
 0xcaa   :  { %v1614_v5 = vpop.eup %1613 }
 0xcab   :  { %v1237_v7 = vadd.f32 1.0, %v1614_v5 }
 0xcac   :  { %v1616_v6 = vpop.eup %1615 }
 0xcad   :  { %v1236_v9 = vadd.f32 1.0, %v1616_v6  ;;  %v1239_v11 = vmul.f32 %v1237_v7, %v1231_v54 }
 0xcaf   :  { %v1238_v10 = vmul.f32 %v1236_v9, %v1230_v8 }
 0xcb1   :  { %1552 = vmatprep.mubr.msk.f32.mxu0 %vm1252_vm4, %v1238_v10 }
 0xcb2   :  { %1553 = vmatmul.mubr.msk.f32.vlgmr.msra.gmra.mxu0 %vm1252_vm4, %v1239_v11 }
 0xd72   :  { %v1554_v52 = vpop.f32.mrf.mxu0 }
 0xd73   :  { %v1331_v20 = vadd.f32 %v1554_v52, %v1251_v18 }
 0xd74   :  { %v1325_v21 = vpop.f32.mrf.mxu0 }
 0xd75   :  { %v1335_v22 = vadd.f32 %v1331_v20, %v1891_v13  ;;  %v1326_v23 = vadd.f32 %v1325_v21, %v1251_v18 }
 0xd77   :  { %1337 = vst.msk [vmem:[#allocation5 + $0x8] sm:$0xff] %vm44_vm0, %v1335_v22  ;;  %v1334_v24 = vadd.f32 %v1326_v23, %v1894_v19 }
 0xd79   :  { %1336 = vst.msk [vmem:[#allocation5] sm:$0xff] %vm44_vm0, %v1334_v24 }
 0xd7a   :  { %1648 = shalt.err (!%p1645_p9)
}
 0xd7b   :  { %1349 = dma.vmem_to_hbm [thread:$0]  %s1344_s24, 256, %s1965_s5, [#allocation4], %s1662_s21, %s1662_s21, %s1663_s22  }
 0xd7c   :  { %1659 = dma.done.wait [#allocation4], 256  }
 0xd7d   :  { %1660 = vsyncadd [#allocation4], 4294967040 }
 0xd7e   :  { %1353 = vsyncpa [#allocation3], 1 }
 0xd7f   :  { %1354 = vsyncpa [#allocation4], 1 }

</bundles_post_ra>
